<compile_context>
chip_gen: v7x
topology: tpu7x:2x2x1
jax: 0.10.0
libtpu: 0.0.40
codegen_flags: <defaults>
</compile_context>

<pallas_src>
import numpy as np
import jax
import jax.numpy as jnp
from jax import lax
from jax.experimental import pallas as pl
from jax.experimental.pallas import tpu as pltpu

BN_EPS = 1e-5


def _round_up(n, m):
    return ((n + m - 1) // m) * m


def _pad_axis(x, target, axis):
    pad = target - x.shape[axis]
    if pad <= 0:
        return x
    widths = [(0, 0)] * x.ndim
    widths[axis] = (0, pad)
    return jnp.pad(x, widths)


def _nbytes(x):
    return int(np.prod(x.shape)) * jnp.dtype(x.dtype).itemsize


# ----------------------------------------------------------------------------
# Pallas kernel 1: fused pose / shape MLP heads (lane-dense, bf16 matmuls)
# ----------------------------------------------------------------------------
def _mlp_heads_kernel(xp_ref, xs_ref,
                      w1_ref, b1_ref, g1_ref, be1_ref,
                      w2_ref, b2_ref, g2_ref, be2_ref,
                      wp_ref, bp_ref, initp_ref,
                      ws_ref, bs_ref, inits_ref,
                      pose_out_ref, shape_out_ref):
    f32 = jnp.float32
    bf16 = jnp.bfloat16

    # ---- pose branch: fc1 -> bn1 (batch stats, train mode) -> relu -> head_pose
    xp = xp_ref[...].astype(bf16)                              # (NT, JCp)
    h1 = jnp.dot(xp, w1_ref[...], preferred_element_type=f32)  # (NT, Hp)
    h1 = h1 + b1_ref[...]
    mu1 = jnp.mean(h1, axis=0, keepdims=True)
    d1 = h1 - mu1
    var1 = jnp.mean(d1 * d1, axis=0, keepdims=True)
    h1 = d1 * lax.rsqrt(var1 + BN_EPS) * g1_ref[...] + be1_ref[...]
    h1 = jnp.maximum(h1, 0.0)
    pose = jnp.dot(h1.astype(bf16), wp_ref[...],
                   preferred_element_type=f32)                 # (NT, 256)
    pose_out_ref[...] = pose + bp_ref[...] + initp_ref[...]

    # ---- shape branch: (pre-pooled) fc2 -> bn2 -> relu -> head_shape
    xs = xs_ref[...].astype(bf16)                              # (N, JCp)
    h2 = jnp.dot(xs, w2_ref[...], preferred_element_type=f32)  # (N, Hp)
    h2 = h2 + b2_ref[...]
    mu2 = jnp.mean(h2, axis=0, keepdims=True)
    d2 = h2 - mu2
    var2 = jnp.mean(d2 * d2, axis=0, keepdims=True)
    h2 = d2 * lax.rsqrt(var2 + BN_EPS) * g2_ref[...] + be2_ref[...]
    h2 = jnp.maximum(h2, 0.0)
    shp = jnp.dot(h2.astype(bf16), ws_ref[...],
                  preferred_element_type=f32)                  # (N, 128)
    shape_out_ref[...] = shp + bs_ref[...] + inits_ref[...]


def mlp_heads_pallas(x_pose, x_shape, mp):
    nt, jc = x_pose.shape
    n = x_shape.shape[0]
    jcp = mp['w1'].shape[0]
    hp = mp['w1'].shape[1]
    posep = mp['wp'].shape[1]
    shapep = mp['ws'].shape[1]

    # zero-pad the contraction dim so loads are lane-aligned (math unchanged,
    # the matching w1/w2 rows are zero-padded in init).
    x_pose = _pad_axis(x_pose, jcp, 1)
    x_shape = _pad_axis(x_shape, jcp, 1)

    args = (x_pose, x_shape,
            mp['w1'], mp['b1'], mp['g1'], mp['be1'],
            mp['w2'], mp['b2'], mp['g2'], mp['be2'],
            mp['wp'], mp['bp'], mp['init_pose'],
            mp['ws'], mp['bs'], mp['init_shape'])

    flops = (2 * nt * jcp * hp + 2 * nt * hp * posep
             + 2 * n * jcp * hp + 2 * n * hp * shapep)
    bytes_accessed = (sum(_nbytes(a) for a in args)
                      + nt * posep * 4 + n * shapep * 4)
    ce = pl.CostEstimate(flops=int(flops), transcendentals=int(2 * hp),
                         bytes_accessed=int(bytes_accessed))

    vmem = pl.BlockSpec(memory_space=pltpu.MemorySpace.VMEM)
    pose_p, shape_p = pl.pallas_call(
        _mlp_heads_kernel,
        out_shape=(jax.ShapeDtypeStruct((nt, posep), jnp.float32),
                   jax.ShapeDtypeStruct((n, shapep), jnp.float32)),
        in_specs=[vmem] * len(args),
        out_specs=(vmem, vmem),
        cost_estimate=ce,
    )(*args)

    return pose_p[:, :144], shape_p[:, :10]


# ----------------------------------------------------------------------------
# Pallas kernel 2: pred_joints = J_regressor @ vertices
# Single MXU matmul (17,V)@(V,B*3) — no serial grid over the batch.
# ----------------------------------------------------------------------------
def _jreg_kernel(jreg_ref, verts_ref, out_ref):
    out_ref[...] = jnp.dot(jreg_ref[...], verts_ref[...],
                           preferred_element_type=jnp.float32)


def jreg_pallas(jreg, verts):
    b, v, _ = verts.shape
    j = jreg.shape[0]
    verts2d = jnp.transpose(verts, (1, 0, 2)).reshape(v, b * 3)   # (V, B*3)
    vmem = pl.BlockSpec(memory_space=pltpu.MemorySpace.VMEM)
    out2d = pl.pallas_call(
        _jreg_kernel,
        out_shape=jax.ShapeDtypeStruct((j, b * 3), jnp.float32),
        in_specs=[vmem, vmem],
        out_specs=vmem,
        cost_estimate=pl.CostEstimate(flops=int(2 * j * v * b * 3),
                                      transcendentals=0,
                                      bytes_accessed=int(4 * (j * v + v * b * 3
                                                              + j * b * 3))),
    )(jreg, verts2d)
    return jnp.transpose(out2d.reshape(j, b, 3), (1, 0, 2))        # (B, 17, 3)


# ----------------------------------------------------------------------------
# Plain-JAX glue: rotation conversions (ports of the torch helpers)
# ----------------------------------------------------------------------------
def rot6d_to_rotmat(x):
    x = x.reshape(-1, 3, 2)
    a1, a2 = x[:, :, 0], x[:, :, 1]
    b1 = a1 / jnp.maximum(jnp.linalg.norm(a1, axis=1, keepdims=True), 1e-6)
    dot = jnp.sum(b1 * a2, axis=1, keepdims=True)
    u = a2 - dot * b1
    b2 = u / jnp.maximum(jnp.linalg.norm(u, axis=-1, keepdims=True), 1e-6)
    b3 = jnp.cross(b1, b2, axis=1)
    return jnp.stack([b1, b2, b3], axis=-1)        # (B*24, 3, 3)


def rotation_matrix_to_quaternion(rm, eps=1e-6):   # rm: (B, 3, 4)
    rt = jnp.transpose(rm, (0, 2, 1))              # (B, 4, 3)
    mask_d2 = rt[:, 2, 2] < eps
    mask_d0_d1 = rt[:, 0, 0] > rt[:, 1, 1]
    mask_d0_nd1 = rt[:, 0, 0] < -rt[:, 1, 1]
    t0 = 1 + rt[:, 0, 0] - rt[:, 1, 1] - rt[:, 2, 2]
    q0 = jnp.stack([rt[:, 1, 2] - rt[:, 2, 1], t0,
                    rt[:, 0, 1] + rt[:, 1, 0],
                    rt[:, 2, 0] + rt[:, 0, 2]], -1)
    t1 = 1 - rt[:, 0, 0] + rt[:, 1, 1] - rt[:, 2, 2]
    q1 = jnp.stack([rt[:, 2, 0] - rt[:, 0, 2],
                    rt[:, 0, 1] + rt[:, 1, 0], t1,
                    rt[:, 1, 2] + rt[:, 2, 1]], -1)
    t2 = 1 - rt[:, 0, 0] - rt[:, 1, 1] + rt[:, 2, 2]
    q2 = jnp.stack([rt[:, 0, 1] - rt[:, 1, 0],
                    rt[:, 2, 0] + rt[:, 0, 2],
                    rt[:, 1, 2] + rt[:, 2, 1], t2], -1)
    t3 = 1 + rt[:, 0, 0] + rt[:, 1, 1] + rt[:, 2, 2]
    q3 = jnp.stack([t3, rt[:, 1, 2] - rt[:, 2, 1],
                    rt[:, 2, 0] - rt[:, 0, 2],
                    rt[:, 0, 1] - rt[:, 1, 0]], -1)
    c0 = (mask_d2 & mask_d0_d1)[:, None].astype(q0.dtype)
    c1 = (mask_d2 & ~mask_d0_d1)[:, None].astype(q0.dtype)
    c2 = (~mask_d2 & mask_d0_nd1)[:, None].astype(q0.dtype)
    c3 = (~mask_d2 & ~mask_d0_nd1)[:, None].astype(q0.dtype)
    q = q0 * c0 + q1 * c1 + q2 * c2 + q3 * c3
    denom = jnp.sqrt(t0[:, None] * c0 + t1[:, None] * c1 +
                     t2[:, None] * c2 + t3[:, None] * c3)
    return q / denom * 0.5


def quaternion_to_angle_axis(q):
    q1, q2, q3 = q[..., 1], q[..., 2], q[..., 3]
    sin_sq = q1 * q1 + q2 * q2 + q3 * q3
    sin_theta = jnp.sqrt(sin_sq)
    cos_theta = q[..., 0]
    two_theta = 2.0 * jnp.where(cos_theta < 0.0,
                                jnp.arctan2(-sin_theta, -cos_theta),
                                jnp.arctan2(sin_theta, cos_theta))
    k_pos = two_theta / sin_theta
    k_neg = 2.0 * jnp.ones_like(sin_theta)
    k = jnp.where(sin_sq > 0.0, k_pos, k_neg)
    return jnp.stack([q1 * k, q2 * k, q3 * k], axis=-1)


def rotation_matrix_to_angle_axis(rotmat):         # (B, 3, 3)
    b = rotmat.shape[0]
    hom = jnp.broadcast_to(jnp.array([0.0, 0.0, 1.0],
                                     dtype=jnp.float32).reshape(1, 3, 1),
                           (b, 3, 1))
    rm34 = jnp.concatenate([rotmat, hom], axis=-1)
    aa = quaternion_to_angle_axis(rotation_matrix_to_quaternion(rm34))
    return jnp.where(jnp.isnan(aa), 0.0, aa)


# ----------------------------------------------------------------------------
# Plain-JAX glue: synthetic SMPL (LBS with pose2rot=False)
# ----------------------------------------------------------------------------
SMPL_PARENTS = np.array([-1, 0, 0, 0, 1, 2, 3, 4, 5, 6, 7, 8, 9, 9, 9,
                         12, 13, 14, 16, 17, 18, 19, 20, 21], dtype=np.int32)


def smpl_lbs(betas, rot_mats, smpl):
    # betas (B,10), rot_mats (B,24,3,3)
    b = betas.shape[0]
    v_template, shapedirs = smpl['v_template'], smpl['shapedirs']
    posedirs, j_reg = smpl['posedirs'], smpl['J_regressor']
    lbs_weights = smpl['lbs_weights']
    parents = SMPL_PARENTS                                      # static

    v_shaped = v_template[None] + jnp.einsum('bl,vdl->bvd', betas, shapedirs)
    joints = jnp.einsum('jv,bvd->bjd', j_reg, v_shaped)         # (B,24,3)
    ident = jnp.eye(3, dtype=rot_mats.dtype)
    pose_feature = (rot_mats[:, 1:] - ident).reshape(b, -1)     # (B,207)
    v_posed = v_shaped + jnp.einsum('bp,pvd->bvd', pose_feature, posedirs)

    rel_j = joints.at[:, 1:].add(-joints[:, parents[1:]])

    def make_tf(rot, t):
        top = jnp.concatenate([rot, t[..., None]], axis=-1)     # (B,3,4)
        bot = jnp.broadcast_to(jnp.array([0.0, 0.0, 0.0, 1.0],
                                         dtype=rot.dtype), (b, 1, 4))
        return jnp.concatenate([top, bot], axis=1)              # (B,4,4)

    # Kinematic-chain accumulation.  The loop unrolls into one jitted
    # executable (this forward is jax.jit'd), so there is no per-op dispatch;
    # the 23 steps are inherently sequential (parent dependencies).
    chain = [make_tf(rot_mats[:, 0], rel_j[:, 0])]
    for i in range(1, 24):
        chain.append(chain[int(parents[i])] @ make_tf(rot_mats[:, i],
                                                      rel_j[:, i]))
    transforms = jnp.stack(chain, axis=1)                       # (B,24,4,4)

    j_h = jnp.concatenate(
        [joints, jnp.zeros((b, 24, 1), joints.dtype)], axis=-1)[..., None]
    init_bone = jnp.pad(transforms @ j_h, ((0, 0), (0, 0), (0, 0), (3, 0)))
    rel_transforms = transforms - init_bone

    t_full = jnp.einsum('vk,bkij->bvij', lbs_weights, rel_transforms)
    v_posed_h = jnp.concatenate(
        [v_posed, jnp.ones((b, v_posed.shape[1], 1), v_posed.dtype)], axis=-1)
    verts = jnp.einsum('bvij,bvj->bvi', t_full, v_posed_h)[..., :3]
    return verts


# ----------------------------------------------------------------------------
# Parameter construction (deterministic, synthetic)
# ----------------------------------------------------------------------------
def init_params(key, jc, hidden, n_verts):
    ks = jax.random.split(key, 24)
    f32 = jnp.float32

    def normal(k, shape, scale):
        return (scale * jax.random.normal(k, shape)).astype(f32)

    w1 = normal(ks[0], (jc, hidden), 1.0 / np.sqrt(jc))
    b1 = normal(ks[1], (1, hidden), 0.01)
    g1 = (1.0 + 0.1 * jax.random.normal(ks[2], (1, hidden))).astype(f32)
    be1 = normal(ks[3], (1, hidden), 0.01)
    w2 = normal(ks[4], (jc, hidden), 1.0 / np.sqrt(jc))
    b2 = normal(ks[5], (1, hidden), 0.01)
    g2 = (1.0 + 0.1 * jax.random.normal(ks[6], (1, hidden))).astype(f32)
    be2 = normal(ks[7], (1, hidden), 0.01)
    # head_pose / head_shape: xavier_uniform with gain=0.01 -> tiny weights
    wp = normal(ks[8], (hidden, 144), 0.001)
    bp = normal(ks[9], (1, 144), 0.001)
    ws = normal(ks[10], (hidden, 10), 0.001)
    bs = normal(ks[11], (1, 10), 0.001)
    # synthetic SMPL mean params (identity-like 6D pose + small noise)
    base6d = jnp.tile(jnp.array([1., 0., 0., 1., 0., 0.], dtype=f32), 24)
    init_pose = (base6d + 0.01 * jax.random.normal(ks[12], (144,))
                 ).reshape(1, 144).astype(f32)
    init_shape = normal(ks[13], (1, 10), 0.1)

    # ---- lane-dense / bf16 packing for the Pallas MLP kernel
    jcp = _round_up(jc, 128)          # contraction dim
    hp = _round_up(hidden, 128)       # hidden dim
    posep = _round_up(144, 128)       # 256
    shapep = _round_up(10, 128)       # 128
    bf16 = jnp.bfloat16
    mlp = {
        'w1': _pad_axis(_pad_axis(w1, jcp, 0), hp, 1).astype(bf16),
        'b1': _pad_axis(b1, hp, 1),
        'g1': _pad_axis(g1, hp, 1),     # zero-padded gamma keeps pad cols = 0
        'be1': _pad_axis(be1, hp, 1),
        'w2': _pad_axis(_pad_axis(w2, jcp, 0), hp, 1).astype(bf16),
        'b2': _pad_axis(b2, hp, 1),
        'g2': _pad_axis(g2, hp, 1),
        'be2': _pad_axis(be2, hp, 1),
        'wp': _pad_axis(_pad_axis(wp, hp, 0), posep, 1).astype(bf16),
        'bp': _pad_axis(bp, posep, 1),
        'init_pose': _pad_axis(init_pose, posep, 1),
        'ws': _pad_axis(_pad_axis(ws, hp, 0), shapep, 1).astype(bf16),
        'bs': _pad_axis(bs, shapep, 1),
        'init_shape': _pad_axis(init_shape, shapep, 1),
    }

    # TODO(synk): real SMPL loads model files from args.data_root; replaced by
    # a deterministic synthetic SMPL (V vertices) with the same LBS math.
    smpl = {}
    smpl['v_template'] = normal(ks[14], (n_verts, 3), 0.2)
    smpl['shapedirs'] = normal(ks[15], (n_verts, 3, 10), 0.01)
    smpl['posedirs'] = normal(ks[16], (207, n_verts, 3), 0.001)
    jr = jnp.abs(jax.random.normal(ks[17], (24, n_verts))).astype(f32)
    smpl['J_regressor'] = jr / jnp.sum(jr, axis=1, keepdims=True)
    smpl['lbs_weights'] = jax.nn.softmax(
        2.0 * jax.random.normal(ks[18], (n_verts, 24)), axis=-1).astype(f32)

    jr36 = jnp.abs(jax.random.normal(ks[19], (17, n_verts))).astype(f32)
    j_regressor_h36m = jr36 / jnp.sum(jr36, axis=1, keepdims=True)

    return {'mlp': mlp, 'smpl': smpl, 'J_regressor_h36m': j_regressor_h36m}


# ----------------------------------------------------------------------------
# Full forward
# ----------------------------------------------------------------------------
def smpl_regressor_forward(feat, params):
    n, t, j, c = feat.shape
    nt = n * t
    feat3 = feat.reshape(n, t, j * c).astype(jnp.float32)

    # flatten + temporal mean-pool hoisted out of the kernel (lane-aligned 2-D
    # inputs; avoids in-kernel reshape / axis-1 XLU reduce).
    x_pose = feat3.reshape(nt, j * c)
    x_shape = jnp.mean(feat3, axis=1)                    # AdaptiveAvgPool over T

    # NOTE: dropout p=0.0 -> identity; BatchNorm uses batch statistics
    # (module default training mode), computed over all NT / N rows in-kernel.
    pose6d, shape = mlp_heads_pallas(x_pose, x_shape, params['mlp'])

    pred_shape = jnp.broadcast_to(shape[None], (t, n, 10))
    pred_shape = jnp.transpose(pred_shape, (1, 0, 2)).reshape(nt, 10)

    pred_rotmat = rot6d_to_rotmat(pose6d).reshape(nt, 24, 3, 3)

    pred_vertices = smpl_lbs(pred_shape, pred_rotmat, params['smpl']) * 1000.0

    pred_joints = jreg_pallas(params['J_regressor_h36m'], pred_vertices)

    pose_aa = rotation_matrix_to_angle_axis(
        pred_rotmat.reshape(-1, 3, 3)).reshape(nt, 72)
    theta = jnp.concatenate([pose_aa, pred_shape], axis=1)
    return [{'theta': theta, 'verts': pred_vertices, 'kp_3d': pred_joints}]


# ----------------------------------------------------------------------------
if __name__ == "__main__":
    N, T, J, C = 2, 8, 17, 32        # small dim_rep=32 (default 512)
    HIDDEN = 64                      # small hidden (default 2048)
    N_VERTS = 64                     # synthetic SMPL vertex count

    feat = jax.random.normal(jax.random.PRNGKey(0), (N, T, J, C),
                             dtype=jnp.float32)
    params = init_params(jax.random.PRNGKey(1), J * C, HIDDEN, N_VERTS)

    forward = jax.jit(smpl_regressor_forward)
    out = forward(feat, params)
    theta = jax.block_until_ready(out[0]['theta'])
    verts = jax.block_until_ready(out[0]['verts'])
    kp3d = jax.block_until_ready(out[0]['kp_3d'])

    assert theta.shape == (N * T, 82)
    assert verts.shape == (N * T, N_VERTS, 3)
    assert kp3d.shape == (N * T, 17, 3)
    assert bool(jnp.all(jnp.isfinite(theta)))
    assert bool(jnp.all(jnp.isfinite(verts)))
    assert bool(jnp.all(jnp.isfinite(kp3d)))
    print("KERNEL_OK")
</pallas_src>

<mosaic_0001>
module attributes {stable_mosaic.version = 11 : i64} {
  func.func @_mlp_heads_kernel(%arg0: memref<16x640xf32, #tpu.memory_space<vmem>>, %arg1: memref<2x640xf32, #tpu.memory_space<vmem>>, %arg2: memref<640x128xbf16, #tpu.memory_space<vmem>>, %arg3: memref<1x128xf32, #tpu.memory_space<vmem>>, %arg4: memref<1x128xf32, #tpu.memory_space<vmem>>, %arg5: memref<1x128xf32, #tpu.memory_space<vmem>>, %arg6: memref<640x128xbf16, #tpu.memory_space<vmem>>, %arg7: memref<1x128xf32, #tpu.memory_space<vmem>>, %arg8: memref<1x128xf32, #tpu.memory_space<vmem>>, %arg9: memref<1x128xf32, #tpu.memory_space<vmem>>, %arg10: memref<128x256xbf16, #tpu.memory_space<vmem>>, %arg11: memref<1x256xf32, #tpu.memory_space<vmem>>, %arg12: memref<1x256xf32, #tpu.memory_space<vmem>>, %arg13: memref<128x128xbf16, #tpu.memory_space<vmem>>, %arg14: memref<1x128xf32, #tpu.memory_space<vmem>>, %arg15: memref<1x128xf32, #tpu.memory_space<vmem>>, %arg16: memref<16x256xf32, #tpu.memory_space<vmem>>, %arg17: memref<2x128xf32, #tpu.memory_space<vmem>>) attributes {dimension_semantics = [], scalar_prefetch = 0 : i64, scratch_operands = 0 : i64, tpu.core_type = #tpu.core_type<tc>} {
    %c0 = arith.constant 0 : index
    %c0_0 = arith.constant 0 : index
    %0 = vector.load %arg0[%c0, %c0_0] : memref<16x640xf32, #tpu.memory_space<vmem>>, vector<16x640xf32>
    %1 = arith.truncf %0 : vector<16x640xf32> to vector<16x640xbf16>
    %c0_1 = arith.constant 0 : index
    %c0_2 = arith.constant 0 : index
    %2 = vector.load %arg2[%c0_1, %c0_2] : memref<640x128xbf16, #tpu.memory_space<vmem>>, vector<640x128xbf16>
    %cst = arith.constant dense<0.000000e+00> : vector<16x128xf32>
    %3 = tpu.matmul %1, %2, %cst {dimension_numbers = #tpu.dot_dimension_numbers<[1], [0], [0], [1], [0, 0, 1, 1], [], []>} : vector<16x640xbf16>, vector<640x128xbf16>, vector<16x128xf32> -> vector<16x128xf32>
    %c0_3 = arith.constant 0 : index
    %c0_4 = arith.constant 0 : index
    %4 = vector.load %arg3[%c0_3, %c0_4] : memref<1x128xf32, #tpu.memory_space<vmem>>, vector<1x128xf32>
    %5 = vector.broadcast %4 : vector<1x128xf32> to vector<16x128xf32>
    %6 = arith.addf %3, %5 : vector<16x128xf32>
    %cst_5 = arith.constant dense<0.000000e+00> : vector<128xf32>
    %7 = vector.multi_reduction <add>, %6, %cst_5 [0] : vector<16x128xf32> to vector<128xf32>
    %8 = vector.shape_cast %7 : vector<128xf32> to vector<1x128xf32>
    %cst_6 = arith.constant 1.600000e+01 : f32
    %9 = vector.broadcast %cst_6 : f32 to vector<1x128xf32>
    %10 = arith.divf %8, %9 : vector<1x128xf32>
    %11 = vector.broadcast %10 : vector<1x128xf32> to vector<16x128xf32>
    %12 = arith.subf %6, %11 : vector<16x128xf32>
    %13 = arith.mulf %12, %12 : vector<16x128xf32>
    %cst_7 = arith.constant dense<0.000000e+00> : vector<128xf32>
    %14 = vector.multi_reduction <add>, %13, %cst_7 [0] : vector<16x128xf32> to vector<128xf32>
    %15 = vector.shape_cast %14 : vector<128xf32> to vector<1x128xf32>
    %cst_8 = arith.constant 1.600000e+01 : f32
    %16 = vector.broadcast %cst_8 : f32 to vector<1x128xf32>
    %17 = arith.divf %15, %16 : vector<1x128xf32>
    %cst_9 = arith.constant 9.99999974E-6 : f32
    %18 = vector.broadcast %cst_9 : f32 to vector<1x128xf32>
    %19 = arith.addf %17, %18 : vector<1x128xf32>
    %20 = math.rsqrt %19 : vector<1x128xf32>
    %21 = vector.broadcast %20 : vector<1x128xf32> to vector<16x128xf32>
    %22 = arith.mulf %12, %21 : vector<16x128xf32>
    %c0_10 = arith.constant 0 : index
    %c0_11 = arith.constant 0 : index
    %23 = vector.load %arg4[%c0_10, %c0_11] : memref<1x128xf32, #tpu.memory_space<vmem>>, vector<1x128xf32>
    %24 = vector.broadcast %23 : vector<1x128xf32> to vector<16x128xf32>
    %25 = arith.mulf %22, %24 : vector<16x128xf32>
    %c0_12 = arith.constant 0 : index
    %c0_13 = arith.constant 0 : index
    %26 = vector.load %arg5[%c0_12, %c0_13] : memref<1x128xf32, #tpu.memory_space<vmem>>, vector<1x128xf32>
    %27 = vector.broadcast %26 : vector<1x128xf32> to vector<16x128xf32>
    %28 = arith.addf %25, %27 : vector<16x128xf32>
    %cst_14 = arith.constant 0.000000e+00 : f32
    %29 = vector.broadcast %cst_14 : f32 to vector<16x128xf32>
    %30 = arith.maximumf %28, %29 : vector<16x128xf32>
    %31 = arith.truncf %30 : vector<16x128xf32> to vector<16x128xbf16>
    %c0_15 = arith.constant 0 : index
    %c0_16 = arith.constant 0 : index
    %32 = vector.load %arg10[%c0_15, %c0_16] : memref<128x256xbf16, #tpu.memory_space<vmem>>, vector<128x256xbf16>
    %cst_17 = arith.constant dense<0.000000e+00> : vector<16x256xf32>
    %33 = tpu.matmul %31, %32, %cst_17 {dimension_numbers = #tpu.dot_dimension_numbers<[1], [0], [0], [1], [0, 0, 1, 1], [], []>} : vector<16x128xbf16>, vector<128x256xbf16>, vector<16x256xf32> -> vector<16x256xf32>
    %c0_18 = arith.constant 0 : index
    %c0_19 = arith.constant 0 : index
    %34 = vector.load %arg11[%c0_18, %c0_19] : memref<1x256xf32, #tpu.memory_space<vmem>>, vector<1x256xf32>
    %35 = vector.broadcast %34 : vector<1x256xf32> to vector<16x256xf32>
    %36 = arith.addf %33, %35 : vector<16x256xf32>
    %c0_20 = arith.constant 0 : index
    %c0_21 = arith.constant 0 : index
    %37 = vector.load %arg12[%c0_20, %c0_21] : memref<1x256xf32, #tpu.memory_space<vmem>>, vector<1x256xf32>
    %38 = vector.broadcast %37 : vector<1x256xf32> to vector<16x256xf32>
    %39 = arith.addf %36, %38 : vector<16x256xf32>
    %c0_22 = arith.constant 0 : index
    %c0_23 = arith.constant 0 : index
    %40 = vector.load %arg16[%c0_22, %c0_23] : memref<16x256xf32, #tpu.memory_space<vmem>>, vector<16x256xf32>
    tpu.vector_store %arg16[%c0_22, %c0_23], %39 {strides = array<i32>} : memref<16x256xf32, #tpu.memory_space<vmem>>, vector<16x256xf32>,
    %c0_24 = arith.constant 0 : index
    %c0_25 = arith.constant 0 : index
    %41 = vector.load %arg1[%c0_24, %c0_25] : memref<2x640xf32, #tpu.memory_space<vmem>>, vector<2x640xf32>
    %42 = arith.truncf %41 : vector<2x640xf32> to vector<2x640xbf16>
    %c0_26 = arith.constant 0 : index
    %c0_27 = arith.constant 0 : index
    %43 = vector.load %arg6[%c0_26, %c0_27] : memref<640x128xbf16, #tpu.memory_space<vmem>>, vector<640x128xbf16>
    %cst_28 = arith.constant dense<0.000000e+00> : vector<2x128xf32>
    %44 = tpu.matmul %42, %43, %cst_28 {dimension_numbers = #tpu.dot_dimension_numbers<[1], [0], [0], [1], [0, 0, 1, 1], [], []>} : vector<2x640xbf16>, vector<640x128xbf16>, vector<2x128xf32> -> vector<2x128xf32>
    %c0_29 = arith.constant 0 : index
    %c0_30 = arith.constant 0 : index
    %45 = vector.load %arg7[%c0_29, %c0_30] : memref<1x128xf32, #tpu.memory_space<vmem>>, vector<1x128xf32>
    %46 = vector.broadcast %45 : vector<1x128xf32> to vector<2x128xf32>
    %47 = arith.addf %44, %46 : vector<2x128xf32>
    %cst_31 = arith.constant dense<0.000000e+00> : vector<128xf32>
    %48 = vector.multi_reduction <add>, %47, %cst_31 [0] : vector<2x128xf32> to vector<128xf32>
    %49 = vector.shape_cast %48 : vector<128xf32> to vector<1x128xf32>
    %cst_32 = arith.constant 2.000000e+00 : f32
    %50 = vector.broadcast %cst_32 : f32 to vector<1x128xf32>
    %51 = arith.divf %49, %50 : vector<1x128xf32>
    %52 = vector.broadcast %51 : vector<1x128xf32> to vector<2x128xf32>
    %53 = arith.subf %47, %52 : vector<2x128xf32>
    %54 = arith.mulf %53, %53 : vector<2x128xf32>
    %cst_33 = arith.constant dense<0.000000e+00> : vector<128xf32>
    %55 = vector.multi_reduction <add>, %54, %cst_33 [0] : vector<2x128xf32> to vector<128xf32>
    %56 = vector.shape_cast %55 : vector<128xf32> to vector<1x128xf32>
    %cst_34 = arith.constant 2.000000e+00 : f32
    %57 = vector.broadcast %cst_34 : f32 to vector<1x128xf32>
    %58 = arith.divf %56, %57 : vector<1x128xf32>
    %cst_35 = arith.constant 9.99999974E-6 : f32
    %59 = vector.broadcast %cst_35 : f32 to vector<1x128xf32>
    %60 = arith.addf %58, %59 : vector<1x128xf32>
    %61 = math.rsqrt %60 : vector<1x128xf32>
    %62 = vector.broadcast %61 : vector<1x128xf32> to vector<2x128xf32>
    %63 = arith.mulf %53, %62 : vector<2x128xf32>
    %c0_36 = arith.constant 0 : index
    %c0_37 = arith.constant 0 : index
    %64 = vector.load %arg8[%c0_36, %c0_37] : memref<1x128xf32, #tpu.memory_space<vmem>>, vector<1x128xf32>
    %65 = vector.broadcast %64 : vector<1x128xf32> to vector<2x128xf32>
    %66 = arith.mulf %63, %65 : vector<2x128xf32>
    %c0_38 = arith.constant 0 : index
    %c0_39 = arith.constant 0 : index
    %67 = vector.load %arg9[%c0_38, %c0_39] : memref<1x128xf32, #tpu.memory_space<vmem>>, vector<1x128xf32>
    %68 = vector.broadcast %67 : vector<1x128xf32> to vector<2x128xf32>
    %69 = arith.addf %66, %68 : vector<2x128xf32>
    %cst_40 = arith.constant 0.000000e+00 : f32
    %70 = vector.broadcast %cst_40 : f32 to vector<2x128xf32>
    %71 = arith.maximumf %69, %70 : vector<2x128xf32>
    %72 = arith.truncf %71 : vector<2x128xf32> to vector<2x128xbf16>
    %c0_41 = arith.constant 0 : index
    %c0_42 = arith.constant 0 : index
    %73 = vector.load %arg13[%c0_41, %c0_42] : memref<128x128xbf16, #tpu.memory_space<vmem>>, vector<128x128xbf16>
    %cst_43 = arith.constant dense<0.000000e+00> : vector<2x128xf32>
    %74 = tpu.matmul %72, %73, %cst_43 {dimension_numbers = #tpu.dot_dimension_numbers<[1], [0], [0], [1], [0, 0, 1, 1], [], []>} : vector<2x128xbf16>, vector<128x128xbf16>, vector<2x128xf32> -> vector<2x128xf32>
    %c0_44 = arith.constant 0 : index
    %c0_45 = arith.constant 0 : index
    %75 = vector.load %arg14[%c0_44, %c0_45] : memref<1x128xf32, #tpu.memory_space<vmem>>, vector<1x128xf32>
    %76 = vector.broadcast %75 : vector<1x128xf32> to vector<2x128xf32>
    %77 = arith.addf %74, %76 : vector<2x128xf32>
    %c0_46 = arith.constant 0 : index
    %c0_47 = arith.constant 0 : index
    %78 = vector.load %arg15[%c0_46, %c0_47] : memref<1x128xf32, #tpu.memory_space<vmem>>, vector<1x128xf32>
    %79 = vector.broadcast %78 : vector<1x128xf32> to vector<2x128xf32>
    %80 = arith.addf %77, %79 : vector<2x128xf32>
    %c0_48 = arith.constant 0 : index
    %c0_49 = arith.constant 0 : index
    %81 = vector.load %arg17[%c0_48, %c0_49] : memref<2x128xf32, #tpu.memory_space<vmem>>, vector<2x128xf32>
    tpu.vector_store %arg17[%c0_48, %c0_49], %80 {strides = array<i32>} : memref<2x128xf32, #tpu.memory_space<vmem>>, vector<2x128xf32>,
    return
  }
}

module attributes {stable_mosaic.version = 11 : i64} {
  func.func @_jreg_kernel(%arg0: memref<17x64xf32, #tpu.memory_space<vmem>>, %arg1: memref<64x48xf32, #tpu.memory_space<vmem>>, %arg2: memref<17x48xf32, #tpu.memory_space<vmem>>) attributes {dimension_semantics = [], scalar_prefetch = 0 : i64, scratch_operands = 0 : i64, tpu.core_type = #tpu.core_type<tc>} {
    %c0 = arith.constant 0 : index
    %c0_0 = arith.constant 0 : index
    %0 = vector.load %arg0[%c0, %c0_0] : memref<17x64xf32, #tpu.memory_space<vmem>>, vector<17x64xf32>
    %c0_1 = arith.constant 0 : index
    %c0_2 = arith.constant 0 : index
    %1 = vector.load %arg1[%c0_1, %c0_2] : memref<64x48xf32, #tpu.memory_space<vmem>>, vector<64x48xf32>
    %cst = arith.constant dense<0.000000e+00> : vector<17x48xf32>
    %2 = tpu.matmul %0, %1, %cst {dimension_numbers = #tpu.dot_dimension_numbers<[1], [0], [0], [1], [0, 0, 1, 1], [], []>} : vector<17x64xf32>, vector<64x48xf32>, vector<17x48xf32> -> vector<17x48xf32>
    %c0_3 = arith.constant 0 : index
    %c0_4 = arith.constant 0 : index
    %3 = vector.load %arg2[%c0_3, %c0_4] : memref<17x48xf32, #tpu.memory_space<vmem>>, vector<17x48xf32>
    tpu.vector_store %arg2[%c0_3, %c0_4], %2 {strides = array<i32>} : memref<17x48xf32, #tpu.memory_space<vmem>>, vector<17x48xf32>,
    return
  }
}

</mosaic_0001>

<bundles_post_ra>
// kernel: squeeze.118
= control target key start
LH: loop header
LB: loop body
LE: loop exit
PB: predicated region body
PF: predicated region fallthrough
CT: control target
= control target key end

     0   :  { %v32_v5 = vmov 0.0   ;;  %s58_s0 = inlined_call_operand.vmem [shape: bf16[16,3], index: 0, kind: input, shape index: {}]   ;;  %s59_s1 = inlined_call_operand.vmem [shape: bf16[16,3,1], index: 1, kind: output, shape index: {}]  }
   0x1   :  { %v4_v0 = vld [vmem:[%s58_s0] ss:$0 sm:$0xff]  ;;  %v29_v1 = vld [vmem:[%s58_s0 + $0x1] ss:$0 sm:$0xff] }
   0x2   :  { %v5_v2 = vunpack.i.l.bf16 %v4_v0  ;;  %v14_v3 = vunpack.i.h.bf16 %v4_v0  ;;  %v21_v4 = vunpack.i.l.bf16 %v29_v1 }
   0x4   :  { %v9_v6 = vpack.c.bf16 %v32_v5, %v5_v2  ;;  %v17_v7 = vpack.c.bf16 %v32_v5, %v14_v3  ;;  %v26_v8 = vpack.c.bf16 %v32_v5, %v21_v4 }
   0x6   :  { %10 = vst [vmem:[%s59_s1] sm:$0x1] %v9_v6  ;;  %28 = vst [vmem:[%s59_s1 + $0x1] sm:$0x1] %v17_v7 }
   0x7   :  { %30 = vst [vmem:[%s59_s1 + $0x2] sm:$0x1] %v26_v8 }

// kernel: squeeze.110
= control target key start
LH: loop header
LB: loop body
LE: loop exit
PB: predicated region body
PF: predicated region fallthrough
CT: control target
= control target key end

     0   :  { %s46_s0 = inlined_call_operand.vmem [shape: f32[16,3], index: 0, kind: input, shape index: {}]   ;;  %s47_s1 = inlined_call_operand.vmem [shape: f32[16,3,1], index: 1, kind: output, shape index: {}]  }
   0x1   :  { %v4_v0 = vld [vmem:[%s46_s0] ss:$0 sm:$0xff]  ;;  %v14_v1 = vld [vmem:[%s46_s0 + $0x1] ss:$0 sm:$0xff]  ;;  %v16_v2 = vld [vmem:[%s46_s0 + $0x2] ss:$0 sm:$0xff] }
   0x2   :  { %5 = vst [vmem:[%s47_s1] sm:$0x1] %v4_v0  ;;  %15 = vst [vmem:[%s47_s1 + $0x1] sm:$0x1] %v14_v1 }
   0x3   :  { %17 = vst [vmem:[%s47_s1 + $0x2] sm:$0x1] %v16_v2 }

// kernel: smpl_regressor_forward.2
= control target key start
LH: loop header
LB: loop body
LE: loop exit
PB: predicated region body
PF: predicated region fallthrough
CT: control target
= control target key end

     0   :  { %v1801_v36 = vmov 0.0   ;;  %vm1802_vm0 = vmmov 0   ;;  %vm1223_vm1 = vcmask 1041408   ;;  %s2332_s2 = inlined_call_operand.vmem [shape: bf16[640,128], index: 2, kind: input, shape index: {}]   ;;  %s2333_s0 = inlined_call_operand.vmem [shape: f32[16,640], index: 0, kind: input, shape index: {}]   ;;  %s2334_s10 = inlined_call_operand.vmem [shape: bf16[128,256], index: 10, kind: input, shape index: {}]   ;;  %s2335_s6 = inlined_call_operand.vmem [shape: bf16[640,128], index: 6, kind: input, shape index: {}]   ;;  %s2336_s1 = inlined_call_operand.vmem [shape: f32[2,640], index: 1, kind: input, shape index: {}]   ;;  %s2337_s3 = inlined_call_operand.vmem [shape: f32[1,128], index: 3, kind: input, shape index: {}]   ;;  %s2338_s4 = inlined_call_operand.vmem [shape: f32[1,128], index: 4, kind: input, shape index: {}]   ;;  %s2339_s5 = inlined_call_operand.vmem [shape: f32[1,128], index: 5, kind: input, shape index: {}]   ;;  %s2340_s13 = inlined_call_operand.vmem [shape: bf16[128,128], index: 13, kind: input, shape index: {}]   ;;  %s2341_s11 = inlined_call_operand.vmem [shape: f32[1,256], index: 11, kind: input, shape index: {}]   ;;  %s2342_s12 = inlined_call_operand.vmem [shape: f32[1,256], index: 12, kind: input, shape index: {}]   ;;  %s2343_s16 = inlined_call_operand.vmem [shape: f32[16,256], index: 16, kind: output, shape index: {0}]   ;;  %s2344_s7 = inlined_call_operand.vmem [shape: f32[1,128], index: 7, kind: input, shape index: {}]   ;;  %s2345_s8 = inlined_call_operand.vmem [shape: f32[1,128], index: 8, kind: input, shape index: {}]   ;;  %s2346_s9 = inlined_call_operand.vmem [shape: f32[1,128], index: 9, kind: input, shape index: {}]   ;;  %s2347_s14 = inlined_call_operand.vmem [shape: f32[1,128], index: 14, kind: input, shape index: {}]   ;;  %s2348_s15 = inlined_call_operand.vmem [shape: f32[1,128], index: 15, kind: input, shape index: {}]   ;;  %s2349_s17 = inlined_call_operand.vmem [shape: f32[2,128], index: 17, kind: output, shape index: {1}]  }
   0x1   :  { %2352 = sst [smem:[#allocation2_spill]] %s2332_s2  ;;  %v1726_v56 = vld [vmem:[%s2334_s10 + $0x4] ss:$8 sps:$4 sm:$0xff]   ;;  %v1724_v57 = vld [vmem:[%s2334_s10] ss:$8 sps:$4 sm:$0xff]  }
   0x2   :  { %2353 = sst [smem:[#allocation3_spill]] %s2333_s0  ;;  %s2354_s26 = sld [smem:[#allocation2_spill]]  ;;  %v1727_v58 = vld [vmem:[%s2335_s6 + $0x40] sm:$0xff]   ;;  %v1731_v60 = vld [vmem:[%s2334_s10 + $0x14] ss:$8 sps:$4 sm:$0xff]   ;;  %v1732_v62 = vld [vmem:[%s2335_s6 + $0x48] sm:$0xff]  }
   0x3   :  { %s2355_s19 = sld [smem:[#allocation3_spill]]  ;;  %v1728_v59 = vld [vmem:[%s2335_s6] sm:$0xff]   ;;  %v1729_v61 = vld [vmem:[%s2334_s10 + $0x10] ss:$8 sps:$4 sm:$0xff]   ;;  %v1733_v63 = vld [vmem:[%s2335_s6 + $0x8] sm:$0xff]  }
   0x8   :  { %v1684_v0 = vld [vmem:[%s2354_s26 + $0x40] sm:$0xff]   ;;  %v1688_v4 = vld [vmem:[%s2354_s26 + $0x48] sm:$0xff]   ;;  %v1692_v8 = vld [vmem:[%s2354_s26 + $0x50] sm:$0xff]  }
   0x9   :  { %v1685_v1 = vld [vmem:[%s2354_s26] sm:$0xff]   ;;  %1505 = vmatprep.subr.bf16.mxu0 %v1684_v0  ;;  %v1689_v5 = vld [vmem:[%s2354_s26 + $0x8] sm:$0xff]   ;;  %v1693_v9 = vld [vmem:[%s2354_s26 + $0x10] sm:$0xff]  }
   0xa   :  { %v1686_v2 = vld [vmem:[%s2354_s26 + $0xc0] sm:$0xff]   ;;  %1506 = vmatpush3.bf16.msra.mxu0 %v1685_v1  ;;  %v1690_v6 = vld [vmem:[%s2354_s26 + $0xc8] sm:$0xff]   ;;  %v1694_v10 = vld [vmem:[%s2354_s26 + $0xd0] sm:$0xff]  }
   0xb   :  { %v1687_v3 = vld [vmem:[%s2354_s26 + $0x80] sm:$0xff]   ;;  %1527 = vmatprep.subr.bf16.mxu1 %v1686_v2  ;;  %1507 = vmatprep.subr.bf16.mxu0 %v1688_v4  ;;  %v1691_v7 = vld [vmem:[%s2354_s26 + $0x88] sm:$0xff]   ;;  %v1695_v11 = vld [vmem:[%s2354_s26 + $0x90] sm:$0xff]  }
   0xc   :  { %1528 = vmatpush3.bf16.msra.mxu1 %v1687_v3  ;;  %v1696_v12 = vld [vmem:[%s2354_s26 + $0x58] sm:$0xff]   ;;  %v1700_v16 = vld [vmem:[%s2354_s26 + $0x60] sm:$0xff]   ;;  %v1704_v20 = vld [vmem:[%s2354_s26 + $0x68] sm:$0xff]  }
   0xd   :  { %1529 = vmatprep.subr.bf16.mxu1 %v1690_v6  ;;  %v1697_v13 = vld [vmem:[%s2354_s26 + $0x18] sm:$0xff]   ;;  %v1701_v17 = vld [vmem:[%s2354_s26 + $0x20] sm:$0xff]   ;;  %v1705_v21 = vld [vmem:[%s2354_s26 + $0x28] sm:$0xff]  }
   0xe   :  { %1508 = vmatpush3.bf16.msra.mxu0 %v1689_v5  ;;  %v1698_v14 = vld [vmem:[%s2354_s26 + $0xd8] sm:$0xff]   ;;  %v1702_v18 = vld [vmem:[%s2354_s26 + $0xe0] sm:$0xff]   ;;  %v1706_v22 = vld [vmem:[%s2354_s26 + $0xe8] sm:$0xff]  }
   0xf   :  { %1509 = vmatprep.subr.bf16.mxu0 %v1692_v8  ;;  %v1699_v15 = vld [vmem:[%s2354_s26 + $0x98] sm:$0xff]   ;;  %v1703_v19 = vld [vmem:[%s2354_s26 + $0xa0] sm:$0xff]   ;;  %v1707_v23 = vld [vmem:[%s2354_s26 + $0xa8] sm:$0xff]  }
  0x10   :  { %1530 = vmatpush3.bf16.msra.mxu1 %v1691_v7  ;;  %v1708_v24 = vld [vmem:[%s2354_s26 + $0x70] sm:$0xff]   ;;  %v1712_v28 = vld [vmem:[%s2354_s26 + $0x78] sm:$0xff]   ;;  %v57_v31 = vld [vmem:[%s2355_s19 + $0x8] sm:$0xff] }
  0x11   :  { %1531 = vmatprep.subr.bf16.mxu1 %v1694_v10  ;;  %v1709_v25 = vld [vmem:[%s2354_s26 + $0x30] sm:$0xff]   ;;  %v1713_v29 = vld [vmem:[%s2354_s26 + $0x38] sm:$0xff]   ;;  %v56_v35 = vld [vmem:[%s2355_s19] sm:$0xff] }
  0x12   :  { %1510 = vmatpush3.bf16.msra.mxu0 %v1693_v9  ;;  %v1710_v26 = vld [vmem:[%s2354_s26 + $0xf0] sm:$0xff]   ;;  %v1714_v30 = vld [vmem:[%s2354_s26 + $0xf8] sm:$0xff]   ;;  %v61_v37 = vld [vmem:[%s2355_s19 + $0x28] sm:$0xff] }
  0x13   :  { %1511 = vmatprep.subr.bf16.mxu0 %v1696_v12  ;;  %v1711_v27 = vld [vmem:[%s2354_s26 + $0xb0] sm:$0xff]   ;;  %v1715_v34 = vld [vmem:[%s2354_s26 + $0xb8] sm:$0xff]   ;;  %v64_v39 = vld [vmem:[%s2355_s19 + $0x40] sm:$0xff]  ;;  %v66_v40 = vpack.c.bf16 %v61_v37, %v56_v35 }
  0x14   :  { %1532 = vmatpush3.bf16.msra.mxu1 %v1695_v11  ;;  %v62_v32 = vld [vmem:[%s2355_s19 + $0x30] sm:$0xff]  ;;  %v59_v38 = vld [vmem:[%s2355_s19 + $0x18] sm:$0xff]  ;;  %v1716_v42 = vld [vmem:[%s2354_s26 + $0x100] sm:$0xff]  }
  0x15   :  { %1533 = vmatprep.subr.bf16.mxu1 %v1698_v14  ;;  %v67_v33 = vpack.c.bf16 %v62_v32, %v57_v31  ;;  %v69_v41 = vpack.c.bf16 %v64_v39, %v59_v38  ;;  %v58_v43 = vld [vmem:[%s2355_s19 + $0x10] sm:$0xff]  ;;  %v63_v44 = vld [vmem:[%s2355_s19 + $0x38] sm:$0xff]  ;;  %v1717_v46 = vld [vmem:[%s2354_s26 + $0x108] sm:$0xff]   ;;  %v1804_v32 = vmov 0  }
  0x16   :  { %1512 = vmatpush3.bf16.msra.mxu0 %v1697_v13  ;;  %v68_v45 = vpack.c.bf16 %v63_v44, %v58_v43  ;;  %v1718_v47 = vld [vmem:[%s2354_s26 + $0x110] sm:$0xff]   ;;  %v1719_v48 = vld [vmem:[%s2354_s26 + $0x118] sm:$0xff]   ;;  %v1720_v49 = vld [vmem:[%s2354_s26 + $0x120] sm:$0xff]  }
  0x17   :  { %1513 = vmatprep.subr.bf16.mxu0 %v1700_v16  ;;  %430 = vmatprep.mubr.bf16.mxu0 %v67_v33  ;;  %v1721_v50 = vld [vmem:[%s2354_s26 + $0x128] sm:$0xff]   ;;  %v1722_v51 = vld [vmem:[%s2354_s26 + $0x130] sm:$0xff]   ;;  %v1723_v52 = vld [vmem:[%s2354_s26 + $0x138] sm:$0xff]  }
  0x18   :  { %1534 = vmatpush3.bf16.msra.mxu1 %v1699_v15  ;;  %471 = vmatprep.mubr.bf16.mxu1 %v69_v41  ;;  %v60_v53 = vld [vmem:[%s2355_s19 + $0x20] sm:$0xff]  ;;  %v65_v54 = vld [vmem:[%s2355_s19 + $0x48] sm:$0xff]  ;;  %v1737_v2 = vld [vmem:[%s2335_s6 + $0x50] sm:$0xff]  }
  0x19   :  { %1535 = vmatprep.subr.bf16.mxu1 %v1702_v18  ;;  %v70_v55 = vpack.c.bf16 %v65_v54, %v60_v53  ;;  %v1736_v0 = vld [vmem:[%s2334_s10 + $0x24] ss:$8 sps:$4 sm:$0xff]   ;;  %v1734_v1 = vld [vmem:[%s2334_s10 + $0x20] ss:$8 sps:$4 sm:$0xff]   ;;  %v1738_v3 = vld [vmem:[%s2335_s6 + $0x10] sm:$0xff]   ;;  %v585_v18 = vlaneseq }
  0x1a   :  { %1514 = vmatpush3.bf16.msra.mxu0 %v1701_v17  ;;  %v1741_v4 = vld [vmem:[%s2334_s10 + $0x34] ss:$8 sps:$4 sm:$0xff]   ;;  %v1739_v5 = vld [vmem:[%s2334_s10 + $0x30] ss:$8 sps:$4 sm:$0xff]   ;;  %v1746_v8 = vld [vmem:[%s2334_s10 + $0x44] ss:$8 sps:$4 sm:$0xff]  }
  0x1b   :  { %1515 = vmatprep.subr.bf16.mxu0 %v1704_v20  ;;  %v1742_v6 = vld [vmem:[%s2335_s6 + $0x58] sm:$0xff]   ;;  %v1744_v9 = vld [vmem:[%s2334_s10 + $0x40] ss:$8 sps:$4 sm:$0xff]   ;;  %v1756_v16 = vld [vmem:[%s2334_s10 + $0x64] ss:$8 sps:$4 sm:$0xff]  }
  0x1c   :  { %1536 = vmatpush3.bf16.msra.mxu1 %v1703_v19  ;;  %v1743_v7 = vld [vmem:[%s2335_s6 + $0x18] sm:$0xff]   ;;  %v1747_v10 = vld [vmem:[%s2335_s6 + $0x60] sm:$0xff]   ;;  %v1752_v14 = vld [vmem:[%s2335_s6 + $0x68] sm:$0xff]  }
  0x1d   :  { %1537 = vmatprep.subr.bf16.mxu1 %v1706_v22  ;;  %v1748_v11 = vld [vmem:[%s2335_s6 + $0x20] sm:$0xff]   ;;  %v1751_v12 = vld [vmem:[%s2334_s10 + $0x54] ss:$8 sps:$4 sm:$0xff]   ;;  %v1749_v13 = vld [vmem:[%s2334_s10 + $0x50] ss:$8 sps:$4 sm:$0xff]  }
  0x1e   :  { %1516 = vmatpush3.bf16.msra.mxu0 %v1705_v21  ;;  %v1753_v15 = vld [vmem:[%s2335_s6 + $0x28] sm:$0xff]   ;;  %v1757_v19 = vld [vmem:[%s2335_s6 + $0x70] sm:$0xff]   ;;  %v2139_v21 = vshrl.u32 %v585_v18, 7  ;;  %v1803_v22 = vmov 1983009808   ;;  %v1766_v38 = vld [vmem:[%s2335_s6 + $0x100] sm:$0xff]  }
  0x1f   :  { %1517 = vmatprep.subr.bf16.mxu0 %v1708_v24  ;;  %v1754_v17 = vld [vmem:[%s2334_s10 + $0x60] ss:$8 sps:$4 sm:$0xff]   ;;  %v1758_v20 = vld [vmem:[%s2335_s6 + $0x30] sm:$0xff]   ;;  %v1775_v41 = vld [vmem:[%s2335_s6 + $0x118] sm:$0xff]  }
  0x20   :  { %1538 = vmatpush3.bf16.msra.mxu1 %v1707_v23  ;;  %v744_v23 = vunpack.c.l.s4 %v1803_v22  ;;  %v1761_v24 = vld [vmem:[%s2334_s10 + $0x74] ss:$8 sps:$4 sm:$0xff]   ;;  %v1769_v39 = vld [vmem:[%s2335_s6 + $0x108] sm:$0xff]  }
  0x21   :  { %1539 = vmatprep.subr.bf16.mxu1 %v1710_v26  ;;  %v1781_v43 = vld [vmem:[%s2335_s6 + $0x128] sm:$0xff]  }
  0x22   :  { %1518 = vmatpush3.bf16.msra.mxu0 %v1709_v25  ;;  %v1759_v25 = vld [vmem:[%s2334_s10 + $0x70] ss:$8 sps:$4 sm:$0xff]   ;;  %v745_v26 = vunpack.c.0.s8 %v744_v23 }
  0x23   :  { %1519 = vmatprep.subr.bf16.mxu0 %v1712_v28  ;;  %v738_v28 = vld [vmem:[%s2336_s1] sm:$0xff] }
  0x24   :  { %1540 = vmatpush3.bf16.msra.mxu1 %v1711_v27  ;;  %v1762_v27 = vld [vmem:[%s2335_s6 + $0x78] sm:$0xff]   ;;  %v748_v31 = vsub.s32 %v745_v26, %v2139_v21  ;;  %v742_v44 = vcombine.high %v738_v28, %v738_v28 }
  0x25   :  { %1541 = vmatprep.subr.bf16.mxu1 %v1714_v30  ;;  %v1764_v30 = vld [vmem:[%s2335_s6 + $0xc0] sm:$0xff]  }
  0x26   :  { %1520 = vmatpush3.bf16.msra.mxu0 %v1713_v29  ;;  %v1763_v29 = vld [vmem:[%s2335_s6 + $0x38] sm:$0xff]   ;;  %v749_v33 = vrot.slane %v738_v28, %v748_v31 }
  0x27   :  { %1620 = vmatprep.subr.bf16.mxu0 %v1801_v36 }
  0x28   :  { %1542 = vmatpush3.bf16.msra.mxu1 %v1715_v34  ;;  %v757_v34 = vcombine.high %v749_v33, %v749_v33  ;;  %v771_v35 = vpack.c.bf16 %v749_v33, %v749_v33 }
  0x29   :  { %431 = vmatmul.mubr.bf16.vlgmr.msra.gmra.mrb[0].mxu0 %v66_v40  ;;  %675 = vmatprep.subr.bf16.mxu1 %v1726_v56  ;;  %v1772_v40 = vld [vmem:[%s2335_s6 + $0x110] sm:$0xff]  }
  0x2a   :  { %1621 = vmatpush3.bf16.msra.mxu0 %v1716_v42  ;;  %1636 = vmatprep.mubr.msk.bf16.mxu0 %vm1802_vm0, %v1801_v36  ;;  %v772_v37 = vpack.c.bf16 %v757_v34, %v757_v34  ;;  %v1778_v42 = vld [vmem:[%s2335_s6 + $0x120] sm:$0xff]  }
  0x2b   :  { %472 = vmatmul.mubr.bf16.vlgmr.msra.gmra.mrb[0].mxu1 %v68_v45  ;;  %1622 = vmatprep.subr.bf16.mxu0 %v1801_v36  ;;  %v2186_v45 = vrot.slane %v742_v44, %v748_v31  ;;  %v1765_v44 = vld [vmem:[%s2335_s6 + $0x80] sm:$0xff]  }
  0x2c   :  { %676 = vmatpush1.bf16.msra.mxu1 %v1724_v57  ;;  %707 = vmatprep.mubr.bf16.mxu1 %v1804_v32  ;;  %v1433_v32 = vld [vmem:[%s2338_s4] ss:$0 sm:$0xff] }
  0x2d   :  { %677 = vmatprep.subr.bf16.mxu1 %v1731_v60 }
  0x2e   :  { %1623 = vmatpush3.bf16.msra.mxu0 %v1717_v46  ;;  %v1784_v46 = vld [vmem:[%s2335_s6 + $0x130] sm:$0xff]  }
  0x2f   :  { %1624 = vmatprep.subr.bf16.mxu0 %v1801_v36 }
  0x30   :  { %678 = vmatpush1.bf16.msra.mxu1 %v1729_v61 }
  0x31   :  { %679 = vmatprep.subr.bf16.mxu1 %v1736_v0 }
  0x32   :  { %1625 = vmatpush3.bf16.msra.mxu0 %v1718_v47  ;;  %v1788_v47 = vld [vmem:[%s2335_s6 + $0x138] sm:$0xff]  }
  0x33   :  { %1626 = vmatprep.subr.bf16.mxu0 %v1801_v36 }
  0x34   :  { %680 = vmatpush1.bf16.msra.mxu1 %v1734_v1 }
  0x35   :  { %681 = vmatprep.subr.bf16.mxu1 %v1741_v4 }
  0x36   :  { %1627 = vmatpush3.bf16.msra.mxu0 %v1719_v48  ;;  %v1451_v48 = vld.sshfl [vmem:[%s2336_s1 + $0x8] sm:$0x3 pattern:$0x76325410] }
  0x37   :  { %1628 = vmatprep.subr.bf16.mxu0 %v1801_v36 }
  0x38   :  { %682 = vmatpush1.bf16.msra.mxu1 %v1739_v5 }
  0x39   :  { %683 = vmatprep.subr.bf16.mxu1 %v1746_v8 }
  0x3a   :  { %1629 = vmatpush3.bf16.msra.mxu0 %v1720_v49 }
  0x3b   :  { %1630 = vmatprep.subr.bf16.mxu0 %v1801_v36 }
  0x3c   :  { %684 = vmatpush1.bf16.msra.mxu1 %v1744_v9 }
  0x3d   :  { %685 = vmatprep.subr.bf16.mxu1 %v1751_v12 }
  0x3e   :  { %1631 = vmatpush3.bf16.msra.mxu0 %v1721_v50  ;;  %v1392_v50 = vld [vmem:[%s2337_s3] ss:$0 sm:$0xff] }
  0x3f   :  { %1632 = vmatprep.subr.bf16.mxu0 %v1801_v36 }
  0x40   :  { %686 = vmatpush1.bf16.msra.mxu1 %v1749_v13 }
  0x41   :  { %687 = vmatprep.subr.bf16.mxu1 %v1756_v16 }
  0x42   :  { %1633 = vmatpush3.bf16.msra.mxu0 %v1722_v51 }
  0x43   :  { %1634 = vmatprep.subr.bf16.mxu0 %v1801_v36 }
  0x44   :  { %688 = vmatpush1.bf16.msra.mxu1 %v1754_v17 }
  0x45   :  { %689 = vmatprep.subr.bf16.mxu1 %v1761_v24 }
  0x46   :  { %1635 = vmatpush3.bf16.msra.mxu0 %v1723_v52  ;;  %v775_v52 = vpack.c.bf16 %v1451_v48, %v1451_v48  ;;  %v1767_v48 = vld [vmem:[%s2335_s6 + $0xc8] sm:$0xff]  }
  0x47   :  { %1558 = vmatprep.subr.bf16.mxu0 %v1727_v58 }
  0x48   :  { %690 = vmatpush1.bf16.msra.mxu1 %v1759_v25 }
  0x49   :  { %1637 = vmatmul.mubr.bf16.vlgmr.msra.gmra.mrb[4].mxu0 %v70_v55  ;;  %1580 = vmatprep.subr.bf16.mxu1 %v1764_v30 }
  0x4a   :  { %1559 = vmatpush3.bf16.msra.mxu0 %v1728_v59  ;;  %1135 = vmatprep.mubr.bf16.mxu0 %v772_v37 }
  0x4b   :  { %1560 = vmatprep.subr.bf16.mxu0 %v1732_v62 }
  0x4e   :  { %1561 = vmatpush3.bf16.msra.mxu0 %v1733_v63 }
  0x4f   :  { %1562 = vmatprep.subr.bf16.mxu0 %v1737_v2 }
  0x52   :  { %1563 = vmatpush3.bf16.msra.mxu0 %v1738_v3 }
  0x53   :  { %1564 = vmatprep.subr.bf16.mxu0 %v1742_v6 }
  0x56   :  { %1565 = vmatpush3.bf16.msra.mxu0 %v1743_v7 }
  0x57   :  { %1566 = vmatprep.subr.bf16.mxu0 %v1747_v10 }
  0x5a   :  { %1567 = vmatpush3.bf16.msra.mxu0 %v1748_v11 }
  0x5b   :  { %1568 = vmatprep.subr.bf16.mxu0 %v1752_v14 }
  0x5e   :  { %1569 = vmatpush3.bf16.msra.mxu0 %v1753_v15 }
  0x5f   :  { %1570 = vmatprep.subr.bf16.mxu0 %v1757_v19 }
  0x62   :  { %1571 = vmatpush3.bf16.msra.mxu0 %v1758_v20 }
  0x63   :  { %1572 = vmatprep.subr.bf16.mxu0 %v1762_v27 }
  0x66   :  { %1573 = vmatpush3.bf16.msra.mxu0 %v1763_v29 }
  0x67   :  { %1640 = vmatprep.subr.bf16.mxu0 %v1801_v36 }
  0x69   :  { %1136 = vmatmul.mubr.bf16.vlgmr.msra.gmra.mrb[8].mxu0 %v771_v35  ;;  %v1434_v35 = vld [vmem:[%s2339_s5] ss:$0 sm:$0xff] }
  0x6a   :  { %1641 = vmatpush3.bf16.msra.mxu0 %v1766_v38  ;;  %1656 = vmatprep.mubr.msk.bf16.mxu0 %vm1802_vm0, %v1801_v36 }
  0x6b   :  { %1642 = vmatprep.subr.bf16.mxu0 %v1801_v36 }
  0x6e   :  { %1643 = vmatpush3.bf16.msra.mxu0 %v1769_v39  ;;  %v758_v39 = vcombine.high %v2186_v45, %v2186_v45 }
  0x6f   :  { %1644 = vmatprep.subr.bf16.mxu0 %v1801_v36 }
  0x72   :  { %1645 = vmatpush3.bf16.msra.mxu0 %v1772_v40 }
  0x73   :  { %1646 = vmatprep.subr.bf16.mxu0 %v1801_v36 }
  0x76   :  { %1647 = vmatpush3.bf16.msra.mxu0 %v1775_v41 }
  0x77   :  { %1648 = vmatprep.subr.bf16.mxu0 %v1801_v36 }
  0x7a   :  { %1649 = vmatpush3.bf16.msra.mxu0 %v1778_v42 }
  0x7b   :  { %1650 = vmatprep.subr.bf16.mxu0 %v1801_v36 }
  0x7e   :  { %1651 = vmatpush3.bf16.msra.mxu0 %v1781_v43 }
  0x7f   :  { %1652 = vmatprep.subr.bf16.mxu0 %v1801_v36 }
  0x82   :  { %1653 = vmatpush3.bf16.msra.mxu0 %v1784_v46  ;;  %v774_v46 = vpack.c.bf16 %v758_v39, %v758_v39 }
  0x83   :  { %1654 = vmatprep.subr.bf16.mxu0 %v1801_v36 }
  0x86   :  { %1655 = vmatpush3.bf16.msra.mxu0 %v1788_v47 }
  0x89   :  { %1657 = vmatmul.mubr.bf16.vlgmr.msra.gmra.mrb[12].mxu0 %v775_v52  ;;  %v1773_v52 = vld [vmem:[%s2335_s6 + $0xd8] sm:$0xff]  }
  0xfc   :  { %v1521_v49 = vpop.f32.mrb[0].mxu0 }
  0xfd   :  { %v1522_v51 = vpop.f32.mrb[1].mxu0 }
  0xfe   :  { %v1523_v53 = vadd.f32 %v1522_v51, %v1521_v49  ;;  %v1524_v54 = vpop.f32.mrb[2].mxu0  ;;  %v1543_v55 = vpop.f32.mrb[0].mxu1  ;;  %v1768_v49 = vld [vmem:[%s2335_s6 + $0x88] sm:$0xff]   ;;  %v1771_v51 = vld [vmem:[%s2335_s6 + $0x90] sm:$0xff]  }
  0xff   :  { %v1525_v56 = vpop.f32.mrb[3].mxu0  ;;  %v1544_v57 = vpop.f32.mrb[1].mxu1 }
 0x100   :  { %v433_v58 = vadd.f32 %v1523_v53, %v1392_v50  ;;  %v1526_v59 = vadd.f32 %v1525_v56, %v1524_v54  ;;  %v1545_v60 = vadd.f32 %v1544_v57, %v1543_v55  ;;  %v1546_v61 = vpop.f32.mrb[2].mxu1  ;;  %v1774_v53 = vld [vmem:[%s2335_s6 + $0x98] sm:$0xff]   ;;  %v1776_v54 = vld [vmem:[%s2335_s6 + $0xe0] sm:$0xff]   ;;  %v1779_v56 = vld [vmem:[%s2335_s6 + $0xe8] sm:$0xff]  }
 0x101   :  { %v1547_v62 = vpop.f32.mrb[3].mxu1  ;;  %v1777_v55 = vld [vmem:[%s2335_s6 + $0xa0] sm:$0xff]   ;;  %v1780_v57 = vld [vmem:[%s2335_s6 + $0xa8] sm:$0xff]  }
 0x102   :  { %v436_v63 = vadd.f32 %v1526_v59, %v1392_v50  ;;  %v1548_v0 = vadd.f32 %v1547_v62, %v1546_v61  ;;  %v474_v1 = vadd.f32 %v1545_v60, %v433_v58  ;;  %v1770_v50 = vld [vmem:[%s2335_s6 + $0xd0] sm:$0xff]   ;;  %v1785_v60 = vld [vmem:[%s2335_s6 + $0xf8] sm:$0xff]   ;;  %v773_v62 = vpack.c.bf16 %v2186_v45, %v2186_v45  ;;  %v1789_v45 = vld [vmem:[%s2340_s13] sm:$0xff]  }
 0x103   :  { %v1782_v58 = vld [vmem:[%s2335_s6 + $0xf0] sm:$0xff]   ;;  %v1786_v61 = vld [vmem:[%s2335_s6 + $0xb8] sm:$0xff]  }
 0x104   :  { %v477_v2 = vadd.f32 %v1548_v0, %v436_v63  ;;  %v1783_v59 = vld [vmem:[%s2335_s6 + $0xb0] sm:$0xff]  }
 0x11c   :  { %v514_v3 = vpop.f32.mrb[4].mxu0 }
 0x11d   :  { %v515_v4 = vadd.f32 %v514_v3, %v474_v1  ;;  %v1638_v5 = vpop.f32.mrb[5].mxu0 }
 0x11e   :  { %v517_v6 = vpop.f32.mrb[6].mxu0 }
 0x11f   :  { %v518_v7 = vadd.f32 %v517_v6, %v477_v2  ;;  %v1639_v8 = vpop.f32.mrb[7].mxu0 }
 0x120   :  { %v1790_v8 = vld [vmem:[%s2340_s13 + $0x8] sm:$0xff]  }
 0x121   :  { %v521_v9 = vadd.f32 %v518_v7, %v515_v4 }
 0x123   :  { %v522_v10 = vrot.slane %v521_v9, 4 }
 0x125   :  { %v523_v11 = vadd.f32 %v522_v10, %v521_v9  ;;  %v1791_v9 = vld [vmem:[%s2340_s13 + $0x10] sm:$0xff]   ;;  %v1792_v10 = vld [vmem:[%s2340_s13 + $0x18] sm:$0xff]  }
 0x127   :  { %v524_v12 = vrot.slane %v523_v11, 2 }
 0x129   :  { %v525_v13 = vadd.f32 %v524_v12, %v523_v11  ;;  %v1793_v11 = vld [vmem:[%s2340_s13 + $0x20] sm:$0xff]   ;;  %v1794_v12 = vld [vmem:[%s2340_s13 + $0x28] sm:$0xff]  }
 0x12b   :  { %v526_v14 = vrot.slane %v525_v13, 1 }
 0x12d   :  { %v527_v15 = vadd.f32 %v526_v14, %v525_v13  ;;  %v1795_v13 = vld [vmem:[%s2340_s13 + $0x30] sm:$0xff]   ;;  %v1796_v14 = vld [vmem:[%s2340_s13 + $0x38] sm:$0xff]  }
 0x12f   :  { %v529_v16 = vmul.f32 0.0625, %v527_v15  ;;  %v587_v15 = vsub.s32 0, %v2139_v21 }
 0x131   :  { %v530_v17 = vsub.f32 %v515_v4, %v529_v16  ;;  %v531_v18 = vsub.f32 %v518_v7, %v529_v16  ;;  %v583_v16 = vld [vmem:[%s2341_s11] sm:$0x3] }
 0x133   :  { %v532_v19 = vmul.f32 %v530_v17, %v530_v17  ;;  %v533_v20 = vmul.f32 %v531_v18, %v531_v18 }
 0x135   :  { %v534_v22 = vadd.f32 %v533_v20, %v532_v19  ;;  %v588_v19 = vrot.slane %v583_v16, %v587_v15 }
 0x137   :  { %v535_v23 = vrot.slane %v534_v22, 4 }
 0x139   :  { %v536_v24 = vadd.f32 %v535_v23, %v534_v22 }
 0x13b   :  { %v537_v25 = vrot.slane %v536_v24, 2 }
 0x13c   :  { %v1574_v63 = vpop.f32.mrb[8].mxu0 }
 0x13d   :  { %v538_v26 = vadd.f32 %v537_v25, %v536_v24  ;;  %v1575_v0 = vpop.f32.mrb[9].mxu0 }
 0x13e   :  { %v1576_v1 = vadd.f32 %v1575_v0, %v1574_v63  ;;  %v1577_v2 = vpop.f32.mrb[10].mxu0 }
 0x13f   :  { %v539_v27 = vrot.slane %v538_v26, 1  ;;  %v1578_v3 = vpop.f32.mrb[11].mxu0 }
 0x140   :  { %v1494_v3 = vld [vmem:[%s2346_s9] ss:$0 sm:$0xff] }
 0x141   :  { %v540_v28 = vadd.f32 %v539_v27, %v538_v26 }
 0x143   :  { %v541_v29 = vmul.f32 0.0625, %v540_v28 }
 0x145   :  { %v542_v30 = vadd.f32 1e-05, %v541_v29 }
 0x147   :  { %1797 = vrsqrt.f32 %v542_v30 }
 0x151   :  { %v1798_v31 = vpop.eup %1797 }
 0x152   :  { %v544_v33 = vmul.f32 %v1798_v31, %v530_v17  ;;  %v545_v34 = vmul.f32 %v1798_v31, %v531_v18  ;;  %v591_v17 = vsub.s32 1, %v2139_v21  ;;  %v718_v18 = vld [vmem:[%s2342_s12] sm:$0x3] }
 0x153   :  { %v723_v22 = vrot.slane %v718_v18, %v587_v15 }
 0x154   :  { %v553_v37 = vmul.f32 %v1433_v32, %v544_v33  ;;  %v554_v38 = vmul.f32 %v1433_v32, %v545_v34  ;;  %v592_v20 = vrot.slane %v583_v16, %v591_v17  ;;  %v727_v24 = vrot.slane %v718_v18, %v591_v17  ;;  %v1452_v34 = vld [vmem:[%s2344_s7] ss:$0 sm:$0xff] }
 0x156   :  { %v563_v40 = vadd.f32 %v1434_v35, %v554_v38  ;;  %v562_v41 = vadd.f32 %v1434_v35, %v553_v37  ;;  %v1138_v38 = vadd.f32 %v1576_v1, %v1452_v34  ;;  %v1493_v1 = vld [vmem:[%s2345_s8] ss:$0 sm:$0xff] }
 0x158   :  { %v565_v42 = vmax.f32 %v563_v40, 0.0  ;;  %v564_v43 = vmax.f32 %v562_v41, 0.0 }
 0x15a   :  { %v566_v47 = vpack.c.bf16 %v565_v42, %v564_v43 }
 0x15c   :  { %708 = vmatmul.mubr.bf16.vlgmr.msra.gmra.mrb[4].mxu1 %v566_v47  ;;  %v2260_v4 = vpop.f32.mrb[12].mxu0 }
 0x15d   :  { %1581 = vmatpush3.bf16.msra.mxu1 %v1765_v44  ;;  %1175 = vmatprep.mubr.bf16.mxu1 %v774_v46  ;;  %v1658_v5 = vpop.f32.mrb[13].mxu0 }
 0x15e   :  { %1582 = vmatprep.subr.bf16.mxu1 %v1767_v48  ;;  %v1220_v6 = vpop.f32.mrb[14].mxu0 }
 0x15f   :  { %v1659_v7 = vpop.f32.mrb[15].mxu0 }
 0x161   :  { %1583 = vmatpush3.bf16.msra.mxu1 %v1768_v49 }
 0x162   :  { %1584 = vmatprep.subr.bf16.mxu1 %v1770_v50 }
 0x165   :  { %1585 = vmatpush3.bf16.msra.mxu1 %v1771_v51 }
 0x166   :  { %1586 = vmatprep.subr.bf16.mxu1 %v1773_v52 }
 0x169   :  { %1587 = vmatpush3.bf16.msra.mxu1 %v1774_v53 }
 0x16a   :  { %1588 = vmatprep.subr.bf16.mxu1 %v1776_v54 }
 0x16d   :  { %1589 = vmatpush3.bf16.msra.mxu1 %v1777_v55 }
 0x16e   :  { %1590 = vmatprep.subr.bf16.mxu1 %v1779_v56 }
 0x171   :  { %1591 = vmatpush3.bf16.msra.mxu1 %v1780_v57 }
 0x172   :  { %1592 = vmatprep.subr.bf16.mxu1 %v1782_v58 }
 0x175   :  { %1593 = vmatpush3.bf16.msra.mxu1 %v1783_v59 }
 0x176   :  { %1594 = vmatprep.subr.bf16.mxu1 %v1785_v60 }
 0x179   :  { %1595 = vmatpush3.bf16.msra.mxu1 %v1786_v61 }
 0x17a   :  { %1660 = vmatprep.subr.bf16.mxu1 %v1801_v36 }
 0x17c   :  { %1176 = vmatmul.mubr.bf16.vlgmr.msra.gmra.mrb[8].mxu1 %v773_v62 }
 0x17d   :  { %1676 = vmatprep.mubr.msk.bf16.mxu1 %vm1802_vm0, %v1801_v36  ;;  %1661 = vmatpush3.bf16.msra.mxu1 %v1789_v45  ;;  %v1495_v45 = vld [vmem:[%s2347_s14] ss:$0 sm:$0xff] }
 0x17e   :  { %1662 = vmatprep.subr.bf16.mxu1 %v1801_v36 }
 0x181   :  { %1663 = vmatpush3.bf16.msra.mxu1 %v1790_v8 }
 0x182   :  { %1664 = vmatprep.subr.bf16.mxu1 %v1801_v36 }
 0x185   :  { %1665 = vmatpush3.bf16.msra.mxu1 %v1791_v9  ;;  %v1504_v9 = vld [vmem:[%s2348_s15] ss:$0 sm:$0xff] }
 0x186   :  { %1666 = vmatprep.subr.bf16.mxu1 %v1801_v36 }
 0x189   :  { %1667 = vmatpush3.bf16.msra.mxu1 %v1792_v10 }
 0x18a   :  { %1668 = vmatprep.subr.bf16.mxu1 %v1801_v36 }
 0x18d   :  { %1669 = vmatpush3.bf16.msra.mxu1 %v1793_v11 }
 0x18e   :  { %1670 = vmatprep.subr.bf16.mxu1 %v1801_v36 }
 0x191   :  { %1671 = vmatpush3.bf16.msra.mxu1 %v1794_v12 }
 0x192   :  { %1672 = vmatprep.subr.bf16.mxu1 %v1801_v36 }
 0x195   :  { %1673 = vmatpush3.bf16.msra.mxu1 %v1795_v13 }
 0x196   :  { %1674 = vmatprep.subr.bf16.mxu1 %v1801_v36 }
 0x199   :  { %1675 = vmatpush3.bf16.msra.mxu1 %v1796_v14 }
 0x22f   :  { %v709_v23 = vpop.f32.mrb[4].mxu1 }
 0x230   :  { %v710_v25 = vadd.f32 %v709_v23, %v588_v19  ;;  %v711_v36 = vpop.f32.mrb[5].mxu1 }
 0x231   :  { %v712_v26 = vadd.f32 %v711_v36, %v592_v20  ;;  %v713_v27 = vpop.f32.mrb[6].mxu1 }
 0x232   :  { %v730_v28 = vadd.f32 %v723_v22, %v710_v25  ;;  %v714_v29 = vadd.f32 %v713_v27, %v588_v19  ;;  %v715_v30 = vpop.f32.mrb[7].mxu1 }
 0x233   :  { %v731_v31 = vadd.f32 %v727_v24, %v712_v26  ;;  %v716_v32 = vadd.f32 %v715_v30, %v592_v20 }
 0x234   :  { %734 = vst [vmem:[%s2343_s16] sm:$0xff] %v730_v28  ;;  %v732_v21 = vadd.f32 %v723_v22, %v714_v29 }
 0x235   :  { %735 = vst [vmem:[%s2343_s16 + $0x8] sm:$0xff] %v731_v31  ;;  %v733_v33 = vadd.f32 %v727_v24, %v716_v32 }
 0x236   :  { %736 = vst [vmem:[%s2343_s16 + $0x10] sm:$0xff] %v732_v21 }
 0x237   :  { %737 = vst [vmem:[%s2343_s16 + $0x18] sm:$0xff] %v733_v33 }
 0x24f   :  { %v1596_v35 = vpop.f32.mrb[8].mxu1 }
 0x250   :  { %v1597_v37 = vpop.f32.mrb[9].mxu1 }
 0x251   :  { %v1598_v39 = vadd.f32 %v1597_v37, %v1596_v35  ;;  %v1599_v40 = vpop.f32.mrb[10].mxu1 }
 0x252   :  { %v1600_v41 = vpop.f32.mrb[11].mxu1 }
 0x253   :  { %v1178_v42 = vadd.f32 %v1598_v39, %v1138_v38 }
 0x255   :  { %v1218_v43 = vadd.f32 %v2260_v4, %v1178_v42 }
 0x257   :  { %v1224_v44 = vsel %vm1223_vm1, %v1218_v43, 0.0 }
 0x258   :  { %v1225_v46 = vrot.slane %v1224_v44, 4 }
 0x25a   :  { %v1226_v47 = vadd.f32 %v1225_v46, %v1224_v44 }
 0x25c   :  { %v1227_v48 = vrot.slane %v1226_v47, 2 }
 0x25e   :  { %v1228_v49 = vadd.f32 %v1227_v48, %v1226_v47 }
 0x260   :  { %v1229_v50 = vrot.slane %v1228_v49, 1 }
 0x262   :  { %v1230_v51 = vadd.f32 %v1229_v50, %v1228_v49 }
 0x264   :  { %v1232_v52 = vmul.f32 0.5, %v1230_v51 }
 0x266   :  { %v1233_v53 = vsub.f32 %v1218_v43, %v1232_v52 }
 0x268   :  { %v1234_v54 = vmul.f32 %v1233_v53, %v1233_v53 }
 0x26a   :  { %v1235_v55 = vsel %vm1223_vm1, %v1234_v54, 0.0 }
 0x26b   :  { %v1236_v56 = vrot.slane %v1235_v55, 4 }
 0x26d   :  { %v1237_v57 = vadd.f32 %v1236_v56, %v1235_v55 }
 0x26f   :  { %v1238_v58 = vrot.slane %v1237_v57, 2 }
 0x271   :  { %v1239_v59 = vadd.f32 %v1238_v58, %v1237_v57 }
 0x273   :  { %v1240_v60 = vrot.slane %v1239_v59, 1 }
 0x275   :  { %v1241_v61 = vadd.f32 %v1240_v60, %v1239_v59 }
 0x277   :  { %v1242_v62 = vmul.f32 0.5, %v1241_v61 }
 0x279   :  { %v1243_v63 = vadd.f32 1e-05, %v1242_v62 }
 0x27b   :  { %1799 = vrsqrt.f32 %v1243_v63 }
 0x285   :  { %v1800_v0 = vpop.eup %1799 }
 0x286   :  { %v1245_v2 = vmul.f32 %v1800_v0, %v1233_v53 }
 0x288   :  { %v1253_v4 = vmul.f32 %v1493_v1, %v1245_v2 }
 0x28a   :  { %v1261_v5 = vadd.f32 %v1494_v3, %v1253_v4 }
 0x28c   :  { %v1262_v6 = vmax.f32 %v1261_v5, 0.0 }
 0x28e   :  { %v1263_v7 = vpack.c.bf16 %v1262_v6, %v1262_v6 }
 0x290   :  { %1677 = vmatmul.mubr.bf16.vlgmr.msra.gmra.mrb[12].mxu1 %v1263_v7 }
 0x363   :  { %v1369_v8 = vpop.f32.mrb[12].mxu1 }
 0x364   :  { %v1370_v10 = vadd.f32 %v1495_v45, %v1369_v8  ;;  %v1678_v11 = vpop.f32.mrb[13].mxu1 }
 0x365   :  { %v1372_v12 = vpop.f32.mrb[14].mxu1 }
 0x366   :  { %v1382_v13 = vadd.f32 %v1504_v9, %v1370_v10  ;;  %v1679_v14 = vpop.f32.mrb[15].mxu1 }
 0x368   :  { %1383 = vst [vmem:[%s2349_s17] sm:$0x3] %v1382_v13 }

// kernel: smpl_regressor_forward.3
= control target key start
LH: loop header
LB: loop body
LE: loop exit
PB: predicated region body
PF: predicated region fallthrough
CT: control target
= control target key end

     0   :  { %v183_v0 = vmov 0.0|0.0   ;;  %vm184_vm0 = vmmov 0   ;;  %v185_v6 = vmov 0.0   ;;  %vm22_vm1 = vcmask 523264   ;;  %s246_s1 = inlined_call_operand.vmem [shape: f32[64,48], index: 1, kind: input, shape index: {}]   ;;  %s247_s0 = inlined_call_operand.vmem [shape: f32[17,64], index: 0, kind: input, shape index: {}]   ;;  %s248_s2 = inlined_call_operand.vmem [shape: f32[17,48], index: 2, kind: output, shape index: {}]  }
   0x1   :  { %172 = vmatprep.subr.bf16.mxu1 %v183_v0  ;;  %v14_v1 = vld [vmem:[%s246_s1] sm:$0xff]  ;;  %v15_v2 = vld [vmem:[%s246_s1 + $0x8] sm:$0xff]  ;;  %160 = vmatprep.subr.bf16.mxu0 %v183_v0  ;;  %v16_v3 = vld [vmem:[%s246_s1 + $0x10] sm:$0xff]  ;;  %vm112_vm2 = vcmask 392192   ;;  %vm115_vm3 = vcmask 385024  }
   0x2   :  { %v161_v4 = vpack.c.bf16 %v15_v2, %v14_v1  ;;  %v17_v5 = vld [vmem:[%s246_s1 + $0x18] sm:$0xff]  ;;  %154 = vmatprep.mubr.msk.f32.mxu1 %vm184_vm0, %v185_v6  ;;  %151 = vmatprep.mubr.msk.f32.mxu0 %vm184_vm0, %v185_v6  ;;  %v18_v8 = vld [vmem:[%s246_s1 + $0x20] sm:$0xff]  ;;  %v19_v9 = vld [vmem:[%s246_s1 + $0x28] sm:$0xff] }
   0x3   :  { %v164_v7 = vpack.c.bf16 %v17_v5, %v16_v3  ;;  %v167_v10 = vpack.c.bf16 %v19_v9, %v18_v8  ;;  %v20_v11 = vld [vmem:[%s246_s1 + $0x30] sm:$0xff]  ;;  %v21_v12 = vld [vmem:[%s246_s1 + $0x38] sm:$0xff]  ;;  %v12_v14 = vld [vmem:[%s247_s0 + $0x8] sm:$0xff] }
   0x4   :  { %176 = vmatpush3.bf16.msra.mxu1 %v161_v4  ;;  %162 = vmatpush3.bf16.msra.mxu0 %v161_v4  ;;  %v170_v13 = vpack.c.bf16 %v21_v12, %v20_v11  ;;  %v11_v15 = vld [vmem:[%s247_s0] sm:$0xff]  ;;  %v13_v16 = vld [vmem:[%s247_s0 + $0x10] sm:$0x1] }
   0x5   :  { %173 = vmatprep.subr.bf16.mxu1 %v183_v0  ;;  %163 = vmatprep.subr.bf16.mxu0 %v183_v0 }
   0x8   :  { %177 = vmatpush3.bf16.msra.mxu1 %v164_v7  ;;  %165 = vmatpush3.bf16.msra.mxu0 %v164_v7 }
   0x9   :  { %174 = vmatprep.subr.bf16.mxu1 %v183_v0  ;;  %166 = vmatprep.subr.bf16.mxu0 %v183_v0 }
   0xc   :  { %178 = vmatpush3.bf16.msra.mxu1 %v167_v10  ;;  %168 = vmatpush3.bf16.msra.mxu0 %v167_v10 }
   0xd   :  { %175 = vmatprep.subr.bf16.mxu1 %v183_v0  ;;  %169 = vmatprep.subr.bf16.mxu0 %v183_v0 }
  0x10   :  { %179 = vmatpush3.bf16.msra.mxu1 %v170_v13  ;;  %171 = vmatpush3.bf16.msra.mxu0 %v170_v13 }
  0x13   :  { %155 = vmatmul.mubr.msk.f32.vlgmr.msra.gmra.mrb[0].mxu1 %vm22_vm1, %v12_v14  ;;  %152 = vmatmul.mubr.msk.f32.vlgmr.msra.gmra.mrb[0].mxu0 %vm22_vm1, %v11_v15 }
  0x14   :  { %157 = vmatprep.mubr.msk.f32.mxu1 %vm184_vm0, %v185_v6 }
  0x17   :  { %158 = vmatmul.mubr.msk.f32.gmra.mrb[2].mxu1 %vm22_vm1, %v13_v16 }
  0xe6   :  { %v103_v17 = vpop.f32.mrb[0].mxu1  ;;  %v98_v18 = vpop.f32.mrb[0].mxu0 }
  0xe7   :  { %114 = vst.msk [vmem:[%s248_s2 + $0x8] sm:$0xff] %vm112_vm2, %v103_v17  ;;  %v156_v19 = vpop.f32.mrb[1].mxu1  ;;  %113 = vst.msk [vmem:[%s248_s2] sm:$0xff] %vm112_vm2, %v98_v18  ;;  %v153_v20 = vpop.f32.mrb[1].mxu0 }
  0xea   :  { %v108_v21 = vpop.f32.mrb[2].mxu1 }
  0xeb   :  { %116 = vst.msk [vmem:[%s248_s2 + $0x10] sm:$0x1] %vm115_vm3, %v108_v21  ;;  %v159_v22 = vpop.f32.mrb[3].mxu1 }

</bundles_post_ra>
